<compile_context>
chip_gen: v7x
topology: tpu7x:2x2x1
jax: 0.10.0
libtpu: 0.0.40
codegen_flags: <defaults>
</compile_context>

<pallas_src>
import jax
import jax.numpy as jnp
from jax.experimental import pallas as pl
from jax.experimental.pallas import tpu as pltpu


# ----------------------------------------------------------------------------
# Kernels
# ----------------------------------------------------------------------------
def _encoder_fused_kernel(x_ref, adj_ref, w1_ref, b1_ref, w2_ref, b2_ref, o_ref):
    """Both GCN layers on one (TB, N, N) adjacency block (adj read once)."""
    cdt = adj_ref.dtype                       # f32, or bf16 when use_bf16_adj
    adj = adj_ref[...]                        # (TB, N, N)

    # fc fused into GCN layer 1: z1 = x @ (W_fc @ W1) + (b_fc @ W1 + b1)
    z1 = jnp.einsum("bnf,fh->bnh", x_ref[...], w1_ref[...],
                    preferred_element_type=jnp.float32) + b1_ref[...]
    h = jnp.maximum(
        jnp.einsum("brn,bnh->brh", adj, z1.astype(cdt),
                   preferred_element_type=jnp.float32), 0.0)

    z2 = jnp.einsum("bnh,hf->bnf", h, w2_ref[...],
                    preferred_element_type=jnp.float32) + b2_ref[...]
    y = jnp.maximum(
        jnp.einsum("brn,bnf->brf", adj, z2.astype(cdt),
                   preferred_element_type=jnp.float32), 0.0)

    o_ref[...] = y.astype(o_ref.dtype)


def _gcn_layer_kernel(feat_ref, adj_ref, w_ref, b_ref, o_ref):
    """One GCN layer, row-tiled over adj: o = relu(adj[rows] @ (feat @ W + b)).

    The node-wise linear (feat @ W + b) is recomputed per row tile; with the
    feature dims tiny (<=32) this is a small fraction of the adj contraction.
    """
    cdt = adj_ref.dtype
    z = jnp.einsum("bnf,fo->bno", feat_ref[...], w_ref[...],
                   preferred_element_type=jnp.float32) + b_ref[...]
    o_ref[...] = jnp.maximum(
        jnp.einsum("brn,bno->bro", adj_ref[...], z.astype(cdt),
                   preferred_element_type=jnp.float32), 0.0).astype(o_ref.dtype)


# ----------------------------------------------------------------------------
# Generation-aware sizing
# ----------------------------------------------------------------------------
def _tpu_vmem_and_cores():
    """Return (physical VMEM bytes per TensorCore, TensorCores per chip)."""
    try:
        vmem = int(pltpu.get_tpu_info().vmem_capacity_bytes)
    except Exception:
        vmem = 64 << 20                       # conservative (v7x-sized) fallback
    # v7x: 64 MiB VMEM / TC and 2 TCs per chip; v5e/v6e: 128 MiB and 1 TC.
    cores = 2 if vmem <= (64 << 20) else 1
    return vmem, cores


def _fused_bytes_per_batch(N, fin, hid, fout, adj_itemsize):
    """VMEM bytes per batch element for the fused kernel (incl. intermediates)."""
    stream = 2 * (N * fin * 4 + N * N * adj_itemsize + N * fout * 4)  # 2x buffers
    interm = N * (2 * hid + 2 * fout) * 4 + N * N * 4                 # z1/h/z2/y + adj temps
    return stream + interm


def _largest_divisor_leq(n, cap):
    best = 1
    for d in range(1, n + 1):
        if n % d == 0 and d <= cap:
            best = d
    return best


def _choose_batch_tile(B, per_batch, budget, num_cores):
    cap = max(1, budget // max(per_batch, 1))
    if num_cores > 1 and B >= 2:
        cap = min(cap, max(1, B // num_cores))   # keep every TensorCore busy
    return _largest_divisor_leq(B, cap)


def _choose_row_tile(N, fl, fo, budget, adj_itemsize):
    if N % 8 != 0:
        return N            # full second-to-last dim always satisfies (8,128)
    fixed = 2 * N * fl * 4 + N * fo * 4
    per_row = 2 * (N * adj_itemsize + fo * 4)
    cap = (budget - fixed) // max(per_row, 1)
    best = 8
    for d in range(8, N + 1, 8):
        if N % d == 0 and d <= cap:
            best = d
    return best


# ----------------------------------------------------------------------------
# Wrappers
# ----------------------------------------------------------------------------
def _gcn_layer(feat, adj, w, b, fout, budget, vmem_limit):
    """relu(adj @ (feat @ w + b)) with adj row-tiled (bounded VMEM for any N)."""
    B, N, fl = feat.shape
    a_isz = jnp.dtype(adj.dtype).itemsize
    TN = _choose_row_tile(N, fl, fout, budget, a_isz)
    grid = (B, pl.cdiv(N, TN))

    flops = 2 * B * N * fl * fout + 2 * B * N * N * fout
    bytes_accessed = feat.size * 4 + adj.size * a_isz + B * N * fout * 4

    return pl.pallas_call(
        _gcn_layer_kernel,
        out_shape=jax.ShapeDtypeStruct((B, N, fout), jnp.float32),
        grid_spec=pltpu.PrefetchScalarGridSpec(
            num_scalar_prefetch=0,
            grid=grid,
            in_specs=[
                pl.BlockSpec((1, N, fl), lambda bi, r: (bi, 0, 0)),   # feat (all nodes)
                pl.BlockSpec((1, TN, N), lambda bi, r: (bi, r, 0)),   # adj row tile
                pl.BlockSpec((fl, fout), lambda bi, r: (0, 0)),       # W
                pl.BlockSpec((1, fout), lambda bi, r: (0, 0)),        # b
            ],
            out_specs=pl.BlockSpec((1, TN, fout), lambda bi, r: (bi, r, 0)),
        ),
        compiler_params=pltpu.CompilerParams(
            dimension_semantics=("parallel", "parallel"),
            vmem_limit_bytes=vmem_limit,
        ),
        cost_estimate=pl.CostEstimate(
            flops=flops, transcendentals=0, bytes_accessed=bytes_accessed),
    )(feat, adj, w, b)


def encoder_forward(x, adj, params, *, use_bf16_adj=False, vmem_budget_bytes=None):
    """x: (B, N, Fin) f32, adj: (B, N, N) f32 -> (B, N, Fout) f32."""
    B, N, Fin = x.shape
    w_fc, b_fc, w1, b1, w2, b2 = params
    H = w1.shape[1]
    Fout = w2.shape[1]

    # Algebraic fusion of fc into GCN layer 1 (exact: no nonlinearity between).
    w1f = w_fc @ w1                     # (Fin, H)
    b1f = b_fc @ w1 + b1                # (1, H)

    adj_c = adj.astype(jnp.bfloat16) if use_bf16_adj else adj
    a_isz = jnp.dtype(adj_c.dtype).itemsize

    vmem, cores = _tpu_vmem_and_cores()
    vmem_limit = int(vmem * 0.75)                 # ~48 MiB v7x, ~96 MiB v5e/v6e
    budget = (vmem_budget_bytes if vmem_budget_bytes is not None
              else int(vmem_limit * 0.85))

    per_batch = _fused_bytes_per_batch(N, Fin, H, Fout, a_isz)

    if per_batch <= budget:
        # ------ fused path: both layers on one (TB, N, N) adj block ---------
        TB = _choose_batch_tile(B, per_batch, budget, cores)
        grid = (B // TB,)
        flops = 2 * B * N * (Fin * H + H * Fout) + 2 * B * N * N * (H + Fout)
        bytes_accessed = (x.size * 4 + adj_c.size * a_isz + B * N * Fout * 4
                          + (Fin * H + H + H * Fout + Fout) * 4)
        return pl.pallas_call(
            _encoder_fused_kernel,
            out_shape=jax.ShapeDtypeStruct((B, N, Fout), jnp.float32),
            grid_spec=pltpu.PrefetchScalarGridSpec(
                num_scalar_prefetch=0,
                grid=grid,
                in_specs=[
                    pl.BlockSpec((TB, N, Fin), lambda bi: (bi, 0, 0)),  # x
                    pl.BlockSpec((TB, N, N), lambda bi: (bi, 0, 0)),    # adj
                    pl.BlockSpec((Fin, H), lambda bi: (0, 0)),          # W_fc@W1
                    pl.BlockSpec((1, H), lambda bi: (0, 0)),            # fused bias
                    pl.BlockSpec((H, Fout), lambda bi: (0, 0)),         # W2
                    pl.BlockSpec((1, Fout), lambda bi: (0, 0)),         # b2
                ],
                out_specs=pl.BlockSpec((TB, N, Fout), lambda bi: (bi, 0, 0)),
            ),
            compiler_params=pltpu.CompilerParams(
                dimension_semantics=("parallel",),
                vmem_limit_bytes=vmem_limit,
            ),
            cost_estimate=pl.CostEstimate(
                flops=flops, transcendentals=0, bytes_accessed=bytes_accessed),
        )(x, adj_c, w1f, b1f, w2, b2)

    # ------ large-N fallback: two row-tiled GCN layer calls ------------------
    # TODO(synk): a single-pass K-tiled fused variant would avoid the second
    #             HBM read of adj for very large N.
    h = _gcn_layer(x, adj_c, w1f, b1f, H, budget, vmem_limit)
    return _gcn_layer(h, adj_c, w2, b2, Fout, budget, vmem_limit)


# ----------------------------------------------------------------------------
# Parameters & reference
# ----------------------------------------------------------------------------
def init_params(key, in_ft, out_ft, hidden_unit=16):
    """Deterministic synthetic parameters (stored as (in, out) matrices)."""
    ks = jax.random.split(key, 6)
    scale = 0.1
    w_fc = scale * jax.random.normal(ks[0], (in_ft, in_ft), jnp.float32)
    b_fc = scale * jax.random.normal(ks[1], (1, in_ft), jnp.float32)
    w1 = scale * jax.random.normal(ks[2], (in_ft, hidden_unit), jnp.float32)
    b1 = scale * jax.random.normal(ks[3], (1, hidden_unit), jnp.float32)
    w2 = scale * jax.random.normal(ks[4], (hidden_unit, out_ft), jnp.float32)
    b2 = scale * jax.random.normal(ks[5], (1, out_ft), jnp.float32)
    return (w_fc, b_fc, w1, b1, w2, b2)


def encoder_reference(x, adj, params):
    w_fc, b_fc, w1, b1, w2, b2 = params
    x = x @ w_fc + b_fc
    h = jax.nn.relu(jnp.einsum("bij,bjk->bik", adj, x @ w1 + b1))
    y = jax.nn.relu(jnp.einsum("bij,bjk->bik", adj, h @ w2 + b2))
    return y


def _make_inputs(kx, kadj, B, N, in_ft):
    x = jax.random.normal(kx, (B, N, in_ft), jnp.float32)
    a = jax.random.uniform(kadj, (B, N, N), jnp.float32)
    a = 0.5 * (a + jnp.swapaxes(a, 1, 2)) + jnp.eye(N)[None]
    adj = a / jnp.sum(a, axis=-1, keepdims=True)
    return x, adj


if __name__ == "__main__":
    B, N, IN_FT, OUT_FT, HIDDEN = 2, 8, 16, 32, 16

    key = jax.random.PRNGKey(0)
    kx, kadj, kp = jax.random.split(key, 3)
    params = init_params(kp, IN_FT, OUT_FT, HIDDEN)

    # 1) fused single-block path (f32) at the module's natural small shapes.
    x, adj = _make_inputs(kx, kadj, B, N, IN_FT)
    ref = encoder_reference(x, adj, params)
    out = jax.block_until_ready(encoder_forward(x, adj, params))
    assert out.shape == (B, N, OUT_FT)
    assert jnp.allclose(out, ref, atol=1e-4, rtol=1e-4)

    # 2) large-N row-tiled fallback path (forced via a tiny VMEM budget).
    x2, adj2 = _make_inputs(kx, kadj, B, 128, IN_FT)
    ref2 = encoder_reference(x2, adj2, params)
    out2 = jax.block_until_ready(
        encoder_forward(x2, adj2, params, vmem_budget_bytes=64 * 1024))
    assert jnp.allclose(out2, ref2, atol=1e-4, rtol=1e-4)

    # 3) optional bf16 adjacency contraction (halves HBM traffic of adj).
    out_bf16 = jax.block_until_ready(
        encoder_forward(x, adj, params, use_bf16_adj=True))
    assert jnp.allclose(out_bf16, ref, atol=2e-2, rtol=2e-2)

    print("KERNEL_OK")
</pallas_src>

<mosaic_0001>
module attributes {stable_mosaic.version = 11 : i64} {
  func.func @_encoder_fused_kernel(%arg0: i32, %arg1: memref<1x8x16xf32, #tpu.memory_space<vmem>>, %arg2: memref<1x8x8xf32, #tpu.memory_space<vmem>>, %arg3: memref<16x16xf32, #tpu.memory_space<vmem>>, %arg4: memref<1x16xf32, #tpu.memory_space<vmem>>, %arg5: memref<16x32xf32, #tpu.memory_space<vmem>>, %arg6: memref<1x32xf32, #tpu.memory_space<vmem>>, %arg7: memref<1x8x32xf32, #tpu.memory_space<vmem>>) attributes {dimension_semantics = [#tpu.dimension_semantics<parallel>], iteration_bounds = array<i64: 2>, scalar_prefetch = 0 : i64, scratch_operands = 0 : i64, tpu.core_type = #tpu.core_type<tc>, window_params = [{transform_indices = @transform_0, window_bounds = array<i64: 1, 8, 16>}, {transform_indices = @transform_1, window_bounds = array<i64: 1, 8, 8>}, {pipeline_mode = #tpu.pipeline_mode<synchronous>, transform_indices = @transform_2, window_bounds = array<i64: 16, 16>}, {pipeline_mode = #tpu.pipeline_mode<synchronous>, transform_indices = @transform_3, window_bounds = array<i64: 1, 16>}, {pipeline_mode = #tpu.pipeline_mode<synchronous>, transform_indices = @transform_4, window_bounds = array<i64: 16, 32>}, {pipeline_mode = #tpu.pipeline_mode<synchronous>, transform_indices = @transform_5, window_bounds = array<i64: 1, 32>}, {transform_indices = @transform_6, window_bounds = array<i64: 1, 8, 32>}]} {
    %c0 = arith.constant 0 : index
    %c0_0 = arith.constant 0 : index
    %c0_1 = arith.constant 0 : index
    %0 = vector.load %arg2[%c0, %c0_0, %c0_1] : memref<1x8x8xf32, #tpu.memory_space<vmem>>, vector<1x8x8xf32>
    %c0_2 = arith.constant 0 : index
    %c0_3 = arith.constant 0 : index
    %c0_4 = arith.constant 0 : index
    %1 = vector.load %arg1[%c0_2, %c0_3, %c0_4] : memref<1x8x16xf32, #tpu.memory_space<vmem>>, vector<1x8x16xf32>
    %c0_5 = arith.constant 0 : index
    %c0_6 = arith.constant 0 : index
    %2 = vector.load %arg3[%c0_5, %c0_6] : memref<16x16xf32, #tpu.memory_space<vmem>>, vector<16x16xf32>
    "tpu.trace_start"() <{level = 10 : i32, message = "bnf,fh->bnh"}> : () -> ()
    %cst = arith.constant dense<0.000000e+00> : vector<1x8x16xf32>
    %3 = tpu.matmul %1, %2, %cst {dimension_numbers = #tpu.dot_dimension_numbers<[2], [0], [0, 1], [1], [0, 0, 0, 1, 1, 1], [], []>} : vector<1x8x16xf32>, vector<16x16xf32>, vector<1x8x16xf32> -> vector<1x8x16xf32>
    "tpu.trace_stop"() : () -> ()
    %c0_7 = arith.constant 0 : index
    %c0_8 = arith.constant 0 : index
    %4 = vector.load %arg4[%c0_7, %c0_8] : memref<1x16xf32, #tpu.memory_space<vmem>>, vector<1x16xf32>
    %5 = vector.shape_cast %4 : vector<1x16xf32> to vector<1x1x16xf32>
    %6 = vector.broadcast %5 : vector<1x1x16xf32> to vector<1x8x16xf32>
    %7 = arith.addf %3, %6 : vector<1x8x16xf32>
    "tpu.trace_start"() <{level = 10 : i32, message = "brn,bnh->brh"}> : () -> ()
    %cst_9 = arith.constant dense<0.000000e+00> : vector<1x8x16xf32>
    %8 = tpu.matmul %0, %7, %cst_9 {dimension_numbers = #tpu.dot_dimension_numbers<[2], [1], [1], [2], [0, 0, 0, 1, 1, 2], [0], [0]>} : vector<1x8x8xf32>, vector<1x8x16xf32>, vector<1x8x16xf32> -> vector<1x8x16xf32>
    "tpu.trace_stop"() : () -> ()
    %cst_10 = arith.constant 0.000000e+00 : f32
    %9 = vector.broadcast %cst_10 : f32 to vector<1x8x16xf32>
    %10 = arith.maximumf %8, %9 : vector<1x8x16xf32>
    %c0_11 = arith.constant 0 : index
    %c0_12 = arith.constant 0 : index
    %11 = vector.load %arg5[%c0_11, %c0_12] : memref<16x32xf32, #tpu.memory_space<vmem>>, vector<16x32xf32>
    "tpu.trace_start"() <{level = 10 : i32, message = "bnh,hf->bnf"}> : () -> ()
    %cst_13 = arith.constant dense<0.000000e+00> : vector<1x8x32xf32>
    %12 = tpu.matmul %10, %11, %cst_13 {dimension_numbers = #tpu.dot_dimension_numbers<[2], [0], [0, 1], [1], [0, 0, 0, 1, 1, 1], [], []>} : vector<1x8x16xf32>, vector<16x32xf32>, vector<1x8x32xf32> -> vector<1x8x32xf32>
    "tpu.trace_stop"() : () -> ()
    %c0_14 = arith.constant 0 : index
    %c0_15 = arith.constant 0 : index
    %13 = vector.load %arg6[%c0_14, %c0_15] : memref<1x32xf32, #tpu.memory_space<vmem>>, vector<1x32xf32>
    %14 = vector.shape_cast %13 : vector<1x32xf32> to vector<1x1x32xf32>
    %15 = vector.broadcast %14 : vector<1x1x32xf32> to vector<1x8x32xf32>
    %16 = arith.addf %12, %15 : vector<1x8x32xf32>
    "tpu.trace_start"() <{level = 10 : i32, message = "brn,bnf->brf"}> : () -> ()
    %cst_16 = arith.constant dense<0.000000e+00> : vector<1x8x32xf32>
    %17 = tpu.matmul %0, %16, %cst_16 {dimension_numbers = #tpu.dot_dimension_numbers<[2], [1], [1], [2], [0, 0, 0, 1, 1, 2], [0], [0]>} : vector<1x8x8xf32>, vector<1x8x32xf32>, vector<1x8x32xf32> -> vector<1x8x32xf32>
    "tpu.trace_stop"() : () -> ()
    %cst_17 = arith.constant 0.000000e+00 : f32
    %18 = vector.broadcast %cst_17 : f32 to vector<1x8x32xf32>
    %19 = arith.maximumf %17, %18 : vector<1x8x32xf32>
    %c0_18 = arith.constant 0 : index
    %c0_19 = arith.constant 0 : index
    %c0_20 = arith.constant 0 : index
    %20 = vector.load %arg7[%c0_18, %c0_19, %c0_20] : memref<1x8x32xf32, #tpu.memory_space<vmem>>, vector<1x8x32xf32>
    tpu.vector_store %arg7[%c0_18, %c0_19, %c0_20], %19 {strides = array<i32>} : memref<1x8x32xf32, #tpu.memory_space<vmem>>, vector<1x8x32xf32>,
    return
  }
  func.func @transform_0(%arg0: i32) -> (i32, i32, i32) {
    %c0_i32 = arith.constant 0 : i32
    %c0_i32_0 = arith.constant 0 : i32
    %c0_i32_1 = arith.constant 0 : i32
    return %arg0, %c0_i32, %c0_i32_0 : i32, i32, i32
  }
  func.func @transform_1(%arg0: i32) -> (i32, i32, i32) {
    %c0_i32 = arith.constant 0 : i32
    %c0_i32_0 = arith.constant 0 : i32
    %c0_i32_1 = arith.constant 0 : i32
    return %arg0, %c0_i32, %c0_i32_0 : i32, i32, i32
  }
  func.func @transform_2(%arg0: i32) -> (i32, i32) {
    %c0_i32 = arith.constant 0 : i32
    %c0_i32_0 = arith.constant 0 : i32
    %c0_i32_1 = arith.constant 0 : i32
    return %c0_i32, %c0_i32_0 : i32, i32
  }
  func.func @transform_3(%arg0: i32) -> (i32, i32) {
    %c0_i32 = arith.constant 0 : i32
    %c0_i32_0 = arith.constant 0 : i32
    %c0_i32_1 = arith.constant 0 : i32
    return %c0_i32, %c0_i32_0 : i32, i32
  }
  func.func @transform_4(%arg0: i32) -> (i32, i32) {
    %c0_i32 = arith.constant 0 : i32
    %c0_i32_0 = arith.constant 0 : i32
    %c0_i32_1 = arith.constant 0 : i32
    return %c0_i32, %c0_i32_0 : i32, i32
  }
  func.func @transform_5(%arg0: i32) -> (i32, i32) {
    %c0_i32 = arith.constant 0 : i32
    %c0_i32_0 = arith.constant 0 : i32
    %c0_i32_1 = arith.constant 0 : i32
    return %c0_i32, %c0_i32_0 : i32, i32
  }
  func.func @transform_6(%arg0: i32) -> (i32, i32, i32) {
    %c0_i32 = arith.constant 0 : i32
    %c0_i32_0 = arith.constant 0 : i32
    %c0_i32_1 = arith.constant 0 : i32
    return %arg0, %c0_i32, %c0_i32_0 : i32, i32, i32
  }
}

</mosaic_0001>

<bundles_post_ra>
// kernel: tpu_custom_call.1
= control target key start
LH: loop header
LB: loop body
LE: loop exit
PB: predicated region body
PF: predicated region fallthrough
CT: control target
= control target key end

     0   :  { %s1445_s0 = inlined_call_operand.hbm [shape: f32[2,8,16], index: 0, kind: input, shape index: {}]   ;;  %s1446_s1 = inlined_call_operand.hbm [shape: f32[2,8,8], index: 1, kind: input, shape index: {}]   ;;  %s1447_s2 = inlined_call_operand.hbm [shape: f32[16,16], index: 2, kind: input, shape index: {}]   ;;  %s1448_s3 = inlined_call_operand.vmem [shape: f32[1,16], index: 3, kind: input, shape index: {}]   ;;  %s1449_s4 = inlined_call_operand.hbm [shape: f32[16,32], index: 4, kind: input, shape index: {}]   ;;  %s1450_s5 = inlined_call_operand.vmem [shape: f32[1,32], index: 5, kind: input, shape index: {}]   ;;  %s1451_s6 = inlined_call_operand.hbm [shape: f32[2,8,32], index: 6, kind: output, shape index: {}]  }
   0x1   :  { %1456 = sst [smem:[#allocation17_spill]] %s1447_s2 }
   0x2   :  { %1457 = sst [smem:[#allocation18_spill]] %s1449_s4 }
   0x3   :  { %11 = vsyncpa [#allocation3], 0 }
   0x4   :  { %13 = vsyncpa [#allocation3 + $0x1], 0 }
   0x5   :  { %14 = vsyncpa [#allocation6], 0 }
   0x6   :  { %16 = vsyncpa [#allocation6 + $0x1], 0 }
   0x7   :  { %17 = vsyncpa [#allocation9], 0 }
   0x8   :  { %18 = vsyncpa [#allocation4], 0 }
   0x9   :  { %20 = vsyncpa [#allocation4 + $0x1], 0  ;;  %s1157_s21 = smov 0   ;;  %s1159_s22 = smov 0  }
   0xa   :  { %s1161_s23 = smov 0   ;;  %s1163_s24 = smov 0  }
   0xb LB: > { %s1178_s25 = sadd.s32 4294967295, %s1110_s24   ;;  %s774_s26 = sadd.s32 4294967294, %s1110_s24   ;;  %s1110_s24 = sphi %s1163_s24, %s1481_s24   ;;  %s1106_s23 = sphi %s1161_s23, %s1480_s23   ;;  %s1102_s22 = sphi %s1159_s22, %s1479_s22   ;;  %s1098_s21 = sphi %s1157_s21, %s1478_s21  }
   0xc   : > { %p46_p0 = scmp.ne.s32.totalorder %s1102_s22, %s1098_s21  ;;  %p1452_p1 = scmp.eq.s32.totalorder %s1178_s25, 0 }
   0xd   : > { %p186_p3 = scmp.eq.s32.totalorder %s774_s26, 1  ;;  %p775_p5 = scmp.ge.s32.totalorder %s1110_s24, 1 }
   0xe   : > { %p1187_p4 = por %p1452_p1, %p46_p0  ;;  %p193_p7 = scmp.lt.s32.totalorder %s1110_s24, 3 }
   0xf   : > { %p1192_p6 = por %p186_p3, %p46_p0  ;;  %s1112_s30 = smov [#allocation7]  }
  0x10   : > { %s1458_s27 = scalar_select %p1187_p4, 1, 0 }
  0x11   : > { %s1459_s28 = scalar_select %p1192_p6, 1, 0 }
  0x12   : > { %p1197_p8 = pnand %p775_p5, %p193_p7  ;;  %s205_s7 = sshll.u32 %s1112_s30, 4  ;;  %s1201_s7 = int_to_ptr.vmem [resolvable:$true] %s205_s7 }
  0x13   : > { %s1113_s9 = smov [#allocation8]   ;;  %s1462_s2 = sld [smem:[#allocation17_spill]] }
  0x14   : > { %s1460_s29 = scalar_select %p1197_p8, 1, 0 }
  0x15   : > { %p853_p9 = pneg %p1197_p8  ;;  %s221_s10 = sshll.u32 %s1113_s9, 4  ;;  %s1212_s10 = int_to_ptr.vmem [resolvable:$true] %s221_s10 }
  0x17   : > { %p1208_p11 = pnand %p853_p9, %p1452_p1 }
  0x19   : > { %s916_s13 = scalar_lea.hbm %s1462_s2, 256  ;;  %p918_p13 = pneg %p1208_p11 }
  0x1a   : > { %p917_p12 = scmp.ne.s32.totalorder %s1462_s2, %s916_s13  ;;  %p923_p5 = scmp.lt.u32.totalorder %s916_s13, %s1462_s2 }
  0x1c   : > { %p919_p0 = pnand %p918_p13, %p917_p12 }
  0x1e   : > { %p920_p3 = pneg %p919_p0 }
  0x20   : > { %p925_p7 = pnand %p923_p5, %p920_p3 }
  0x22   : > { %928 = shalt.err (!%p925_p7)
}
  0x23   : > { %s929_s18 = scalar_lea.vmem %s1201_s7, 256  ;;  %p937_p2 = scmp.lt.s32.totalorder %s1201_s7, %s1201_s7 }
  0x24   : > { %p930_p9 = scmp.ne.s32.totalorder %s1201_s7, %s929_s18  ;;  %p938_p12 = scmp.lt.s32.totalorder %s929_s18, %s929_s18 }
  0x26   : > { %p932_p10 = pnand %p930_p9, %p918_p13  ;;  %p939_p0 = por %p938_p12, %p937_p2 }
  0x28   : > { %p933_p1 = pneg %p932_p10 }
  0x2a   : > { %p940_p6 = pnand %p939_p0, %p933_p1 }
  0x2c   : > { %943 = shalt.err (!%p940_p6)
}
  0x2d   : > { %s1114_s19 = smov 128   ;;  %s1115_s20 = smov 8  }
  0x2e   : > { %856 = dma.hbm_to_vmem [thread:$0]  (!%p1208_p11), %s1462_s2, 256, %s1201_s7, [#allocation6], %s1114_s19, %s1114_s19, %s1115_s20  }
  0x2f   : > { %s1463_s4 = sld [smem:[#allocation18_spill]] }
  0x35   : > { %s944_s12 = scalar_lea.hbm %s1463_s4, 256 }
  0x36   : > { %p945_p2 = scmp.ne.s32.totalorder %s1463_s4, %s944_s12  ;;  %p951_p10 = scmp.lt.u32.totalorder %s944_s12, %s1463_s4 }
  0x38   : > { %p947_p1 = pnand %p945_p2, %p918_p13 }
  0x3a   : > { %p948_p6 = pneg %p947_p1 }
  0x3c   : > { %p953_p3 = pnand %p951_p10, %p948_p6 }
  0x3e   : > { %956 = shalt.err (!%p953_p3)
}
  0x3f   : > { %s957_s7 = scalar_lea.vmem %s1212_s10, 256  ;;  %p965_p12 = scmp.lt.s32.totalorder %s1212_s10, %s1212_s10 }
  0x40   : > { %p958_p5 = scmp.ne.s32.totalorder %s1212_s10, %s957_s7  ;;  %p966_p0 = scmp.lt.s32.totalorder %s957_s7, %s957_s7 }
  0x42   : > { %p960_p7 = pnand %p958_p5, %p918_p13  ;;  %p967_p2 = por %p966_p0, %p965_p12 }
  0x44   : > { %p961_p9 = pneg %p960_p7 }
  0x46   : > { %p968_p1 = pnand %p967_p2, %p961_p9 }
  0x48   : > { %971 = shalt.err (!%p968_p1)
}
  0x49   : > { %859 = dma.hbm_to_vmem [thread:$0]  (!%p1208_p11), %s1463_s4, 256, %s1212_s10, [#allocation9], %s1114_s19, %s1114_s19, %s1115_s20  }
  0x4a   : > { %s1267_s26 = sadd.s32 1, %s1110_s24   ;;  %s33_s8 = sadd.s32 1, %s1106_s23 }
  0x4b   : > { %s30_s30 = ssub.s32 %s1110_s24, %s1267_s26  ;;  %p40_p13 = scmp.ne.s32.totalorder %s1106_s23, %s1102_s22 }
  0x4c   : > { %p31_p6 = scmp.eq.s32.totalorder %s30_s30, 0  ;;  %p41_p10 = scmp.eq.s32.totalorder %s1110_s24, 0 }
  0x4d   : > { %p1464_p3 = scmp.eq.s32.totalorder %s1178_s25, 1  ;;  %p873_p7 = scmp.lt.s32.totalorder %s1110_s24, 2 }
  0x4e   : > { %s1283_s11 = scalar_select %p31_p6, %s1106_s23, %s33_s8  }
  0x4f   : > { %p1277_p5 = por %p1464_p3, %p40_p13  ;;  %p42_p9 = por %p41_p10, %p40_p13 }
  0x50   : > { %1466 = sst [smem:[#allocation16_spill]] %s1283_s11  ;;  %s238_s12 = sand.u32 1, %s1106_s23  }
  0x51   : > { %s1465_s9 = scalar_select %p1277_p5, 1, 0 }
  0x52   : > { %s1286_s10 = sshll.u32 %s238_s12, 3  ;;  %s780_s19 = sshll.u32 %s1110_s24, 7 }
  0x53   : > { %s1292_s14 = scalar_lea.hbm %s1445_s0, %s780_s19  ;;  %s242_s15 = scalar_lea.vmem [#allocation2], %s1286_s10 }
  0x54   : > { %s249_s16 = sshll.u32 %s242_s15, 4  ;;  %p1297_p11 = pnand %p873_p7, %p42_p9  ;;  %s1295_s16 = int_to_ptr.vmem [resolvable:$true] %s249_s16 }
  0x55   : > { %s1304_s8 = scalar_lea.hbm %s1446_s1, %s780_s19  ;;  %s256_s30 = sand.u32 1, %s1110_s24  }
  0x56   : > { %s239_s20 = scalar_lea.sflag [#allocation3], %s238_s12  ;;  %s972_s13 = scalar_lea.hbm %s1292_s14, 128 }
  0x57   : > { %p973_p12 = scmp.ne.s32.totalorder %s1292_s14, %s972_s13  ;;  %p974_p0 = pneg %p1297_p11 }
  0x58   : > { %s977_s4 = scalar_lea.hbm %s1445_s0, 256  ;;  %p978_p13 = scmp.lt.u32.totalorder %s1292_s14, %s1445_s0 }
  0x59   : > { %p975_p2 = pnand %p974_p0, %p973_p12  ;;  %p979_p6 = scmp.lt.u32.totalorder %s977_s4, %s972_s13 }
  0x5a   : > { %p981_p3 = scmp.lt.u32.totalorder %s972_s13, %s1292_s14 }
  0x5b   : > { %p976_p1 = pneg %p975_p2  ;;  %p980_p10 = por %p979_p6, %p978_p13 }
  0x5d   : > { %p982_p7 = por %p981_p3, %p980_p10 }
  0x5f   : > { %p983_p9 = pnand %p982_p7, %p976_p1 }
  0x61   : > { %986 = shalt.err (!%p983_p9)
}
  0x62   : > { %s987_s12 = scalar_lea.vmem %s1295_s16, 128  ;;  %s1116_s2 = smov [#allocation2]  }
  0x63   : > { %p988_p12 = scmp.ne.s32.totalorder %s1295_s16, %s987_s12  ;;  %s992_s19 = sshll.u32 %s1116_s2, 4  ;;  %s993_s19 = int_to_ptr.vmem [resolvable:$false] %s992_s19 }
  0x64   : > { %s994_s11 = scalar_lea.vmem %s993_s19, 256  ;;  %p995_p4 = scmp.lt.s32.totalorder %s1295_s16, %s993_s19 }
  0x65   : > { %p990_p2 = pnand %p988_p12, %p974_p0  ;;  %p996_p13 = scmp.lt.s32.totalorder %s994_s11, %s987_s12 }
  0x67   : > { %p991_p5 = pneg %p990_p2  ;;  %p997_p6 = por %p996_p13, %p995_p4 }
  0x69   : > { %p998_p10 = pnand %p997_p6, %p991_p5 }
  0x6b   : > { %1001 = shalt.err (!%p998_p10)
}
  0x6c   : > { %863 = dma.hbm_to_vmem [thread:$0]  (!%p1297_p11), %s1292_s14, 128, %s1295_s16, %s239_s20  }
  0x6d   : > { %s260_s4 = scalar_lea.vmem [#allocation5], %s1286_s10  ;;  %s257_s13 = scalar_lea.sflag [#allocation6], %s256_s30 }
  0x6e   : > { %s267_s18 = sshll.u32 %s260_s4, 4  ;;  %s1002_s15 = scalar_lea.hbm %s1304_s8, 128  ;;  %s268_s18 = int_to_ptr.vmem [resolvable:$true] %s267_s18 }
  0x6f   : > { %p1003_p4 = scmp.ne.s32.totalorder %s1304_s8, %s1002_s15  ;;  %s1007_s2 = scalar_lea.hbm %s1446_s1, 256 }
  0x70   : > { %p1008_p3 = scmp.lt.u32.totalorder %s1304_s8, %s1446_s1  ;;  %p1009_p7 = scmp.lt.u32.totalorder %s1007_s2, %s1002_s15 }
  0x71   : > { %p1005_p5 = pnand %p1003_p4, %p974_p0  ;;  %p1011_p12 = scmp.lt.u32.totalorder %s1002_s15, %s1304_s8 }
  0x72   : > { %p1010_p9 = por %p1009_p7, %p1008_p3 }
  0x73   : > { %p1006_p1 = pneg %p1005_p5 }
  0x74   : > { %p1012_p2 = por %p1011_p12, %p1010_p9 }
  0x76   : > { %p1013_p13 = pnand %p1012_p2, %p1006_p1 }
  0x78   : > { %1016 = shalt.err (!%p1013_p13)
}
  0x79   : > { %s1017_s10 = scalar_lea.vmem %s268_s18, 128  ;;  %s1117_s14 = smov [#allocation5]  }
  0x7a   : > { %p1018_p6 = scmp.ne.s32.totalorder %s268_s18, %s1017_s10  ;;  %s1022_s16 = sshll.u32 %s1117_s14, 4  ;;  %s1023_s16 = int_to_ptr.vmem [resolvable:$false] %s1022_s16 }
  0x7b   : > { %s1024_s30 = scalar_lea.vmem %s1023_s16, 256  ;;  %p1025_p5 = scmp.lt.s32.totalorder %s268_s18, %s1023_s16 }
  0x7c   : > { %p1020_p10 = pnand %p1018_p6, %p974_p0  ;;  %p1026_p8 = scmp.lt.s32.totalorder %s1024_s30, %s1017_s10 }
  0x7e   : > { %p1021_p4 = pneg %p1020_p10  ;;  %p1027_p3 = por %p1026_p8, %p1025_p5 }
  0x80   : > { %p1028_p7 = pnand %p1027_p3, %p1021_p4 }
  0x82   : > { %1031 = shalt.err (!%p1028_p7)
}
  0x83   : > { %866 = dma.hbm_to_vmem [thread:$0]  (!%p1297_p11), %s1304_s8, 128, %s268_s18, %s257_s13  }
  0x84   : > { %p1468_p1 = scmp.ne.s32.totalorder %s1460_s29, 0 }
  0x85   : > { %s1357_s20 = sand.u32 (!%p1468_p1), 1, %s1102_s22   ;;  %p1469_p8 = scmp.ne.s32.totalorder (!%p1468_p1), %s1458_s27, 0 }
  0x86   : > { %276 = sbr.rel (%p1468_p1) target bundleno = 1031 (0x407), region = 44  ;;  %s1360_s4 = sshll.u32 (!%p1468_p1), %s1357_s20, 3 }
  0x87   : > { %s279_s15 = scalar_lea.sflag (!%p1468_p1), [#allocation3], %s1357_s20  ;;  %s282_s17 = scalar_lea.vmem (!%p1468_p1), [#allocation2], %s1360_s4 }
  0x8d   : > { %1077 = dma.done.wait (%p1469_p8), %s279_s15, 128  }
  0x8e   : > { %1079 = vsyncadd (%p1469_p8), %s279_s15, 4294967168  ;;  %s287_s29 = sand.u32 1, %s1178_s25   ;;  %s291_s8 = scalar_lea.vmem [#allocation5], %s1360_s4 }
  0x8f   : > { %s288_s7 = scalar_lea.sflag [#allocation6], %s287_s29 }
  0x90   : > { %1081 = dma.done.wait (%p1469_p8), %s288_s7, 128  }
  0x91   : > { %1083 = vsyncadd (%p1469_p8), %s288_s7, 4294967168  ;;  %p1470_p11 = scmp.eq.s32.totalorder %s1178_s25, 0 }
  0x93   : > { %1085 = dma.done.wait (%p1470_p11), [#allocation6], 256   ;;  %p1471_p0 = pmov %p1470_p11 }
  0x95   : > { %1087 = vsyncadd (%p1471_p0), [#allocation6], 4294967040  ;;  %p1472_p9 = pmov %p1471_p0 }
  0x96   : > { %p1473_p12 = pmov %p1471_p0 }
  0x97   : > { %1089 = dma.done.wait (%p1472_p9), [#allocation9], 256  }
  0x98   : > { %1091 = vsyncadd (%p1473_p12), [#allocation9], 4294967040  ;;  %v1118_v0 = vmov 0.0|0.0   ;;  %vm1119_vm0 = vmmov 0   ;;  %v1120_v1 = vmov 0.0   ;;  %v335_v2 = vld [vmem:[#allocation7] sm:$0xff] }
  0x99   : > { %833 = vmatprep.subr.bf16.mxu0 %v1118_v0  ;;  %813 = vmatprep.mubr.msk.f32.mxu0 %vm1119_vm0, %v1120_v1  ;;  %v336_v3 = vld [vmem:[#allocation7 + $0x8] sm:$0xff]  ;;  %vm344_vm1 = vcmask 130048   ;;  %v789_v6 = vld [vmem:[%s1448_s3] ss:$0 sm:$0xff]  ;;  %v333_v10 = vld [vmem:[%s291_s8] sm:$0xff]  ;;  %vm418_vm2 = vcmask 64512  }
  0x9a   : > { %816 = vmatprep.subr.mxu1 %v1120_v1  ;;  %818 = vmatprep.mubr.msk.f32.mxu1 %vm1119_vm0, %v1120_v1  ;;  %v834_v4 = vpack.c.bf16 %v336_v3, %v335_v2  ;;  %v334_v5 = vld [vmem:[%s282_s17] sm:$0xff]  ;;  %v493_v11 = vld [vmem:[#allocation8] sm:$0xff]  ;;  %v494_v12 = vld [vmem:[#allocation8 + $0x8] sm:$0xff]  ;;  %s796_s2 = sshll.u32 %s1178_s25, 7  ;;  %s332_s19 = scalar_lea.vmem [#allocation10], %s1360_s4  ;;  %vm646_vm3 = vcmask 261120  }
  0x9b   : > { %v837_v13 = vpack.c.bf16 %v494_v12, %v493_v11  ;;  %v792_v17 = vld [vmem:[%s1450_s5] ss:$0 sm:$0xff]  ;;  %s662_s11 = sshll.u32 %s332_s19, 4  ;;  %s1401_s16 = scalar_lea.hbm %s1451_s6, %s796_s2  ;;  %s1403_s11 = int_to_ptr.vmem [resolvable:$true] %s662_s11 }
  0x9c   : > { %835 = vmatpush3.bf16.msra.mxu0 %v834_v4  ;;  %s649_s30 = scalar_lea.sflag [#allocation4], %s1357_s20  ;;  %s1032_s15 = scalar_lea.vmem %s1403_s11, 128 }
  0x9d   : > { %828 = vmatprep.subr.mxu0 %v1120_v1  ;;  %p1033_p2 = scmp.ne.s32.totalorder %s1403_s11, %s1032_s15  ;;  %p1474_p13 = scmp.ne.s32.totalorder %s1465_s9, 0 }
  0x9e   : > { %s1121_s25 = smov [#allocation10]  }
  0x9f   : > { %814 = vmatmul.mubr.msk.f32.vlgmr.msra.gmra.mrb[0].mxu0 %vm344_vm1, %v334_v5  ;;  %p1034_p6 = pnand %p1033_p2, %p1474_p13  ;;  %s1036_s4 = sshll.u32 %s1121_s25, 4  ;;  %s1037_s4 = int_to_ptr.vmem [resolvable:$false] %s1036_s4 }
  0xa0   : > { %830 = vmatprep.mubr.msk.f32.mxu0 %vm1119_vm0, %v1120_v1  ;;  %s1038_s17 = scalar_lea.vmem %s1037_s4, 256  ;;  %p1039_p4 = scmp.lt.s32.totalorder %s1403_s11, %s1037_s4 }
  0xa1   : > { %p1035_p10 = pneg %p1034_p6  ;;  %p1040_p5 = scmp.lt.s32.totalorder %s1038_s17, %s1032_s15 }
  0xa3   : > { %p1041_p3 = por %p1040_p5, %p1039_p4 }
  0xa5   : > { %p1042_p7 = pnand %p1041_p3, %p1035_p10 }
 0x172   : > { %v414_v7 = vpop.f32.mrb[0].mxu0 }
 0x173   : > { %v415_v8 = vadd.f32 %v789_v6, %v414_v7  ;;  %v815_v9 = vpop.f32.mrb[1].mxu0 }
 0x175   : > { %817 = vmatpush3.msra.mxu1 %v415_v8 }
 0x176   : > { %819 = vmatmul.mubr.msk.f32.vlgmr.msra.gmra.mrb[0].mxu1 %vm418_vm2, %v333_v10  ;;  %836 = vmatprep.subr.bf16.mxu1 %v1118_v0 }
 0x177   : > { %825 = vmatprep.mubr.msk.f32.mxu1 %vm1119_vm0, %v1120_v1  ;;  %838 = vmatpush3.bf16.msra.mxu1 %v837_v13 }
 0x249   : > { %v488_v14 = vpop.f32.mrb[0].mxu1 }
 0x24a   : > { %v492_v15 = vmax.f32 %v488_v14, 0.0  ;;  %v820_v16 = vpop.f32.mrb[1].mxu1 }
 0x24c   : > { %826 = vmatmul.mubr.msk.f32.vlgmr.msra.gmra.mrb[2].mxu1 %vm344_vm1, %v492_v15 }
 0x31f   : > { %v571_v18 = vpop.f32.mrb[2].mxu1 }
 0x320   : > { %v572_v19 = vadd.f32 %v792_v17, %v571_v18  ;;  %v827_v20 = vpop.f32.mrb[3].mxu1 }
 0x322   : > { %829 = vmatpush3.msra.mxu0 %v572_v19 }
 0x323   : > { %831 = vmatmul.mubr.msk.f32.vlgmr.msra.gmra.mrb[2].mxu0 %vm418_vm2, %v333_v10 }
 0x3f6   : > { %v641_v21 = vpop.f32.mrb[2].mxu0 }
 0x3f7   : > { %v645_v22 = vmax.f32 %v641_v21, 0.0  ;;  %v832_v23 = vpop.f32.mrb[3].mxu0 }
 0x3f9   : > { %647 = vst.msk [vmem:[%s332_s19] sm:$0xff] %vm646_vm3, %v645_v22 }
 0x3fa   : > { %1045 = shalt.err (!%p1042_p7)
}
 0x3fb   : > { %s1046_s20 = scalar_lea.hbm %s1401_s16, 128  ;;  %s1050_s8 = scalar_lea.hbm %s1451_s6, 256 }
 0x3fc   : > { %p1047_p1 = scmp.ne.s32.totalorder %s1401_s16, %s1046_s20  ;;  %p1051_p0 = scmp.lt.u32.totalorder %s1401_s16, %s1451_s6 }
 0x3fd   : > { %p1052_p9 = scmp.lt.u32.totalorder %s1050_s8, %s1046_s20  ;;  %p1054_p2 = scmp.lt.u32.totalorder %s1046_s20, %s1401_s16 }
 0x3fe   : > { %p1048_p8 = pnand %p1047_p1, %p1474_p13 }
 0x3ff   : > { %p1053_p12 = por %p1052_p9, %p1051_p0 }
 0x400   : > { %p1049_p11 = pneg %p1048_p8 }
 0x401   : > { %p1055_p6 = por %p1054_p2, %p1053_p12 }
 0x403   : > { %p1056_p10 = pnand %p1055_p6, %p1049_p11 }
 0x405   : > { %1059 = shalt.err (!%p1056_p10)
}
 0x406   : > { %851 = dma.vmem_to_hbm [thread:$0]  (%p1474_p13), %s1403_s11, 128, %s1401_s16, %s649_s30  }
 0x407 PF: > { %s674_s13 = sand.u32 1, %s1098_s21   ;;  %p1475_p4 = scmp.ne.s32.totalorder %s1459_s28, 0 }
 0x408   : > { %p1476_p5 = scmp.ge.s32.totalorder %s1110_s24, 2  ;;  %s675_s12 = scalar_lea.sflag [#allocation4], %s674_s13 }
 0x40a   : > { %p868_p3 = pnand %p1476_p5, %p1475_p4 }
 0x40c   : > { %1093 = dma.done.wait (!%p868_p3), %s675_s12, 128  }
 0x40d   : > { %1095 = vsyncadd (!%p868_p3), %s675_s12, 4294967168  ;;  %s1477_s2 = sld [smem:[#allocation16_spill]]  ;;  %p23_p7 = scmp.ge.s32.totalorder %s1267_s26, 4  }
 0x40e   : > { %s1478_s21 = smov %s1102_s22  ;;  %s1479_s22 = smov %s1106_s23 }
 0x40f   : > { %s1481_s24 = smov %s1267_s26  ;;  %25 = sbr.rel (!%p23_p7) target bundleno = 11 (0xb), region = 110 }
 0x413   : > { %s1480_s23 = smov %s1477_s2 }
 0x416   :  { %680 = vsyncpa [#allocation3], 1 }
 0x417   :  { %682 = vsyncpa [#allocation3 + $0x1], 1 }
 0x418   :  { %683 = vsyncpa [#allocation6], 1 }
 0x419   :  { %685 = vsyncpa [#allocation6 + $0x1], 1 }
 0x41a   :  { %686 = vsyncpa [#allocation9], 1 }
 0x41b   :  { %687 = vsyncpa [#allocation4], 1 }
 0x41c   :  { %689 = vsyncpa [#allocation4 + $0x1], 1 }

</bundles_post_ra>
